<compile_context>
chip_gen: v6e
topology: v6e:2x2x1
jax: 0.10.0
libtpu: 0.0.40
codegen_flags: <defaults>
</compile_context>

<pallas_src>
import jax
import jax.numpy as jnp
from jax.experimental import pallas as pl
from jax.experimental.pallas import tpu as pltpu


def _round_up(x, m):
    return ((x + m - 1) // m) * m


def _pad2(x, rows, cols):
    """Zero-pad a 2-D array; no-op (no copy) when already the right shape."""
    r, c = x.shape
    if r == rows and c == cols:
        return x
    return jnp.pad(x, ((0, rows - r), (0, cols - c)))


def _tcr_agg_kernel(e_ref, mask_ref, feat_ref, out_ref, acc_sc, l_sc):
    """Streaming masked-softmax aggregation.  grid = (L splits, B tiles)."""
    b = pl.program_id(1)

    @pl.when(b == 0)
    def _():
        acc_sc[...] = jnp.zeros_like(acc_sc)
        l_sc[...] = jnp.zeros_like(l_sc)

    # Precomputed softmax numerators for this B tile, lane-major: [1, TB] f32.
    e_row = e_ref[...]
    # p[l, j] = mask[l, j] * exp(aw[j] - max(aw))   (mask is exact 0/1 in bf16)
    p = mask_ref[...].astype(jnp.float32) * e_row                 # [TL, TB]  (VPU)
    # Denominator row-sum on the XLU (hides under the MXU matmul below; the
    # ones-column MXU fold would double MXU pushes for D=128, so not used).
    l_sc[...] += jnp.sum(p, axis=1, keepdims=True)                # [TL, 1]
    # Weighted feature sum on the MXU with f32 accumulation.
    acc_sc[...] += jnp.dot(p.astype(feat_ref.dtype), feat_ref[...],
                           preferred_element_type=jnp.float32)    # [TL, D]

    # Finalize on the last B tile: one per-library reciprocal (EUP) broadcast
    # into [TL, D]; empty libraries (denominator == 0) return exactly 0.
    @pl.when(b == pl.num_programs(1) - 1)
    def _():
        l = l_sc[...]
        denom = jnp.where(l > 0, l, 1.0)
        inv = pl.reciprocal(denom, approx=True)       # EUP slot
        inv = inv * (2.0 - denom * inv)               # one Newton step -> ~f32 exact
        out_ref[...] = (acc_sc[...] * inv).astype(out_ref.dtype)


def tcr_aggregator_attention(features, library_mask, w1, b1, w2, b2=None, *,
                             block_b=1024, l_splits=1,
                             matmul_dtype=jnp.bfloat16,
                             buffer_count=None,
                             vmem_limit_bytes=32 * 1024 * 1024):
    """features [B, D], library_mask [L, B] (0/1), params of Linear(D,H)->tanh->Linear(H,1).

    Returns library features [L, D] float32.  `b2` is accepted for API parity but
    unused (the softmax over scores is shift-invariant, so it cancels exactly).
    """
    del b2
    B, D = features.shape
    L = library_mask.shape[0]

    # ---- hoisted attention-score MLP + softmax numerators (tiny, plain XLA) ----
    # Depends only on the batch axis, so it is computed exactly once instead of
    # once per grid step inside the kernel.  A single global (unmasked) max
    # shift equals the reference's per-library masked max (the shift cancels in
    # softmax); numerically safe since tanh bounds |aw| <= sum|w2|, so
    # exp(aw - max) in (0, 1] and every nonempty library's denominator is
    # >= exp(-2 * sum|w2|), far from f32 underflow for the module's H=64 head.
    f32 = jnp.float32
    h = jnp.tanh(features.astype(f32) @ w1.astype(f32)
                 + b1.reshape(1, -1).astype(f32))                 # [B, H]
    aw = (h @ w2.reshape(-1, 1).astype(f32))[:, 0]                # [B]
    e = jnp.exp(aw - jnp.max(aw))                                 # [B] in (0, 1]

    # ---- tiling ----
    # B tile is a lane dim -> multiple of 128; L block is a sublane dim -> multiple of 8.
    tb = min(_round_up(block_b, 128), _round_up(B, 128))
    b_pad = _round_up(B, tb)
    l_block = _round_up(-(-L // l_splits), 8)
    l_pad = l_block * l_splits

    # Pads are skipped when inputs are already tile-aligned.  Zero mask entries
    # make padded items / libraries contribute nothing (exact); padded library
    # rows are sliced off at the end.
    feats_p = _pad2(features.astype(matmul_dtype), b_pad, D)
    mask_p = _pad2(library_mask.astype(jnp.bfloat16), l_pad, b_pad)  # 0/1 exact in bf16
    e_row = _pad2(e.reshape(1, B), 1, b_pad)

    grid = (l_splits, b_pad // tb)

    def _stream_spec(shape, index_map):
        # Optional deeper pipelining (e.g. buffer_count=3 on v5e if DMA is exposed).
        if buffer_count is None:
            return pl.BlockSpec(shape, index_map)
        return pl.BlockSpec(shape, index_map, pipeline_mode=pl.Buffered(buffer_count))

    out = pl.pallas_call(
        _tcr_agg_kernel,
        out_shape=jax.ShapeDtypeStruct((l_pad, D), jnp.float32),
        grid_spec=pltpu.PrefetchScalarGridSpec(
            num_scalar_prefetch=0,
            grid=grid,
            in_specs=[
                pl.BlockSpec((1, tb), lambda s, b: (0, b)),     # exp numerators row (f32)
                _stream_spec((l_block, tb), lambda s, b: (s, b)),   # mask tile (bf16)
                _stream_spec((tb, D), lambda s, b: (b, 0)),         # features tile
            ],
            out_specs=pl.BlockSpec((l_block, D), lambda s, b: (s, 0)),
            scratch_shapes=[
                pltpu.VMEM((l_block, D), jnp.float32),   # running weighted sum
                pltpu.VMEM((l_block, 1), jnp.float32),   # running denominator
            ],
        ),
        compiler_params=pltpu.CompilerParams(
            # L splits are independent ("parallel"); the B axis carries the
            # accumulator state -> "arbitrary".
            dimension_semantics=("parallel", "arbitrary"),
            vmem_limit_bytes=vmem_limit_bytes,
        ),
    )(e_row, mask_p, feats_p)

    return out[:L]


def _reference(features, library_mask, w1, b1, w2, b2):
    """Pure-JAX f32 mirror of TCRAggregator.forward (attention aggregation)."""
    h = jnp.tanh(features @ w1 + b1[None, :])
    aw = (h @ w2 + b2[None, :])[:, 0]
    masked = jnp.where(library_mask > 0, aw[None, :], -jnp.inf)
    has = jnp.sum(library_mask, axis=1, keepdims=True) > 0
    m = jnp.where(has, jnp.max(masked, axis=1, keepdims=True), 0.0)
    e = jnp.where(library_mask > 0, jnp.exp(masked - m), 0.0)
    s = jnp.sum(e, axis=1, keepdims=True)
    w = e / jnp.where(has, s, 1.0)
    return w @ features


if __name__ == "__main__":
    key = jax.random.PRNGKey(0)
    (k_feat, k_mask, k_w1, k_b1, k_w2, k_b2,
     k_feat2, k_mask2) = jax.random.split(key, 8)

    # --- module-default shapes: feature_dim=128, attention hidden 64 ---
    B, D, H, L = 8, 128, 64, 8
    features = jax.random.normal(k_feat, (B, D), dtype=jnp.float32)
    library_mask = jax.random.bernoulli(k_mask, 0.5, (L, B)).astype(jnp.float32)
    library_mask = library_mask.at[L - 1].set(0.0)   # exercise the empty-library path

    w1 = jax.random.normal(k_w1, (D, H), dtype=jnp.float32) * (1.0 / jnp.sqrt(D))
    b1 = jax.random.normal(k_b1, (H,), dtype=jnp.float32) * 0.01
    w2 = jax.random.normal(k_w2, (H, 1), dtype=jnp.float32) * (1.0 / jnp.sqrt(H))
    b2 = jax.random.normal(k_b2, (1,), dtype=jnp.float32) * 0.01

    ref = _reference(features, library_mask, w1, b1, w2, b2)

    # bit-accurate path (f32 MXU inputs)
    out_f32 = jax.block_until_ready(
        tcr_aggregator_attention(features, library_mask, w1, b1, w2, b2,
                                 matmul_dtype=jnp.float32))
    assert out_f32.shape == (L, D)
    assert jnp.allclose(out_f32, ref, atol=1e-4, rtol=1e-4), "f32 mismatch vs reference"

    # default fast path (bf16 MXU inputs / bf16 mask, f32 accumulation + softmax math)
    out_bf16 = jax.block_until_ready(
        tcr_aggregator_attention(features, library_mask, w1, b1, w2, b2))
    assert out_bf16.shape == (L, D)
    assert jnp.allclose(out_bf16, ref, atol=5e-2, rtol=5e-2), "bf16 mismatch vs reference"

    # --- multi-tile path: several B tiles (streamed accumulator) and an L split ---
    B2, L2 = 300, 20
    features2 = jax.random.normal(k_feat2, (B2, D), dtype=jnp.float32)
    mask2 = jax.random.bernoulli(k_mask2, 0.3, (L2, B2)).astype(jnp.float32)
    mask2 = mask2.at[0].set(0.0)                     # another empty library
    ref2 = _reference(features2, mask2, w1, b1, w2, b2)

    out2 = jax.block_until_ready(
        tcr_aggregator_attention(features2, mask2, w1, b1, w2, b2,
                                 block_b=128, l_splits=2,
                                 matmul_dtype=jnp.float32))
    assert out2.shape == (L2, D)
    assert jnp.allclose(out2, ref2, atol=1e-4, rtol=1e-4), "multi-tile mismatch vs reference"

    out2_fast = jax.block_until_ready(
        tcr_aggregator_attention(features2, mask2, w1, b1, w2, b2))
    assert out2_fast.shape == (L2, D)
    assert jnp.allclose(out2_fast, ref2, atol=5e-2, rtol=5e-2), "bf16 multi-tile mismatch"

    print("KERNEL_OK")
</pallas_src>

<mosaic_0001>
module attributes {stable_mosaic.version = 11 : i64} {
  func.func @_tcr_agg_kernel(%arg0: i32, %arg1: i32, %arg2: memref<1x128xf32, #tpu.memory_space<vmem>>, %arg3: memref<8x128xbf16, #tpu.memory_space<vmem>>, %arg4: memref<128x128xf32, #tpu.memory_space<vmem>>, %arg5: memref<8x128xf32, #tpu.memory_space<vmem>>, %arg6: memref<8x128xf32, #tpu.memory_space<vmem>>, %arg7: memref<8x1xf32, #tpu.memory_space<vmem>>) attributes {dimension_semantics = [#tpu.dimension_semantics<parallel>, #tpu.dimension_semantics<arbitrary>], iteration_bounds = array<i64: 1, 1>, scalar_prefetch = 0 : i64, scratch_operands = 2 : i64, tpu.core_type = #tpu.core_type<tc>, window_params = [{transform_indices = @transform_0, window_bounds = array<i64: 1, 128>}, {transform_indices = @transform_1, window_bounds = array<i64: 8, 128>}, {transform_indices = @transform_2, window_bounds = array<i64: 128, 128>}, {transform_indices = @transform_3, window_bounds = array<i64: 8, 128>}]} {
    %c0_i32 = arith.constant 0 : i32
    %0 = arith.cmpi eq, %arg1, %c0_i32 : i32
    %1 = arith.extui %0 : i1 to i32
    %c0_i32_0 = arith.constant 0 : i32
    %2 = arith.cmpi ne, %1, %c0_i32_0 : i32
    scf.if %2 {
      %cst_17 = arith.constant 0.000000e+00 : f32
      %21 = vector.broadcast %cst_17 : f32 to vector<8x128xf32>
      %c0_18 = arith.constant 0 : index
      %c0_19 = arith.constant 0 : index
      %22 = vector.load %arg6[%c0_18, %c0_19] : memref<8x128xf32, #tpu.memory_space<vmem>>, vector<8x128xf32>
      tpu.vector_store %arg6[%c0_18, %c0_19], %21 {strides = array<i32>} : memref<8x128xf32, #tpu.memory_space<vmem>>, vector<8x128xf32>,
      %cst_20 = arith.constant 0.000000e+00 : f32
      %23 = vector.broadcast %cst_20 : f32 to vector<8x1xf32>
      %c0_21 = arith.constant 0 : index
      %c0_22 = arith.constant 0 : index
      %24 = vector.load %arg7[%c0_21, %c0_22] : memref<8x1xf32, #tpu.memory_space<vmem>>, vector<8x1xf32>
      tpu.vector_store %arg7[%c0_21, %c0_22], %23 {strides = array<i32>} : memref<8x1xf32, #tpu.memory_space<vmem>>, vector<8x1xf32>,
    } else {
    }
    %c0 = arith.constant 0 : index
    %c0_1 = arith.constant 0 : index
    %3 = vector.load %arg2[%c0, %c0_1] : memref<1x128xf32, #tpu.memory_space<vmem>>, vector<1x128xf32>
    %c0_2 = arith.constant 0 : index
    %c0_3 = arith.constant 0 : index
    %4 = vector.load %arg3[%c0_2, %c0_3] : memref<8x128xbf16, #tpu.memory_space<vmem>>, vector<8x128xbf16>
    %5 = arith.extf %4 : vector<8x128xbf16> to vector<8x128xf32>
    %6 = vector.broadcast %3 : vector<1x128xf32> to vector<8x128xf32>
    %7 = arith.mulf %5, %6 : vector<8x128xf32>
    %c0_4 = arith.constant 0 : index
    %c0_5 = arith.constant 0 : index
    %8 = vector.load %arg7[%c0_4, %c0_5] : memref<8x1xf32, #tpu.memory_space<vmem>>, vector<8x1xf32>
    %cst = arith.constant dense<0.000000e+00> : vector<8xf32>
    %9 = vector.multi_reduction <add>, %7, %cst [1] : vector<8x128xf32> to vector<8xf32>
    %10 = vector.shape_cast %9 : vector<8xf32> to vector<8x1xf32>
    %11 = arith.addf %8, %10 : vector<8x1xf32>
    %c0_6 = arith.constant 0 : index
    %c0_7 = arith.constant 0 : index
    %12 = vector.load %arg7[%c0_6, %c0_7] : memref<8x1xf32, #tpu.memory_space<vmem>>, vector<8x1xf32>
    tpu.vector_store %arg7[%c0_6, %c0_7], %11 {strides = array<i32>} : memref<8x1xf32, #tpu.memory_space<vmem>>, vector<8x1xf32>,
    %c0_8 = arith.constant 0 : index
    %c0_9 = arith.constant 0 : index
    %13 = vector.load %arg6[%c0_8, %c0_9] : memref<8x128xf32, #tpu.memory_space<vmem>>, vector<8x128xf32>
    %c0_10 = arith.constant 0 : index
    %c0_11 = arith.constant 0 : index
    %14 = vector.load %arg4[%c0_10, %c0_11] : memref<128x128xf32, #tpu.memory_space<vmem>>, vector<128x128xf32>
    %cst_12 = arith.constant dense<0.000000e+00> : vector<8x128xf32>
    %15 = tpu.matmul %7, %14, %cst_12 {dimension_numbers = #tpu.dot_dimension_numbers<[1], [0], [0], [1], [0, 0, 1, 1], [], []>} : vector<8x128xf32>, vector<128x128xf32>, vector<8x128xf32> -> vector<8x128xf32>
    %16 = arith.addf %13, %15 : vector<8x128xf32>
    %c0_13 = arith.constant 0 : index
    %c0_14 = arith.constant 0 : index
    %17 = vector.load %arg6[%c0_13, %c0_14] : memref<8x128xf32, #tpu.memory_space<vmem>>, vector<8x128xf32>
    tpu.vector_store %arg6[%c0_13, %c0_14], %16 {strides = array<i32>} : memref<8x128xf32, #tpu.memory_space<vmem>>, vector<8x128xf32>,
    %c0_i32_15 = arith.constant 0 : i32
    %18 = arith.cmpi eq, %arg1, %c0_i32_15 : i32
    %19 = arith.extui %18 : i1 to i32
    %c0_i32_16 = arith.constant 0 : i32
    %20 = arith.cmpi ne, %19, %c0_i32_16 : i32
    scf.if %20 {
      %c0_17 = arith.constant 0 : index
      %c0_18 = arith.constant 0 : index
      %21 = vector.load %arg7[%c0_17, %c0_18] : memref<8x1xf32, #tpu.memory_space<vmem>>, vector<8x1xf32>
      %cst_19 = arith.constant 0.000000e+00 : f32
      %22 = vector.broadcast %cst_19 : f32 to vector<8x1xf32>
      %23 = arith.cmpf ogt, %21, %22 : vector<8x1xf32>
      %cst_20 = arith.constant 1.000000e+00 : f32
      %24 = vector.broadcast %cst_20 : f32 to vector<8x1xf32>
      %25 = arith.select %23, %21, %24 : vector<8x1xi1>, vector<8x1xf32>
      %26 = tpu.reciprocal %25 {approx = true} : vector<8x1xf32> -> vector<8x1xf32>
      %27 = arith.mulf %25, %26 : vector<8x1xf32>
      %cst_21 = arith.constant 2.000000e+00 : f32
      %28 = vector.broadcast %cst_21 : f32 to vector<8x1xf32>
      %29 = arith.subf %28, %27 : vector<8x1xf32>
      %30 = arith.mulf %26, %29 : vector<8x1xf32>
      %c0_22 = arith.constant 0 : index
      %c0_23 = arith.constant 0 : index
      %31 = vector.load %arg6[%c0_22, %c0_23] : memref<8x128xf32, #tpu.memory_space<vmem>>, vector<8x128xf32>
      %32 = vector.broadcast %30 : vector<8x1xf32> to vector<8x128xf32>
      %33 = arith.mulf %31, %32 : vector<8x128xf32>
      %c0_24 = arith.constant 0 : index
      %c0_25 = arith.constant 0 : index
      %34 = vector.load %arg5[%c0_24, %c0_25] : memref<8x128xf32, #tpu.memory_space<vmem>>, vector<8x128xf32>
      tpu.vector_store %arg5[%c0_24, %c0_25], %33 {strides = array<i32>} : memref<8x128xf32, #tpu.memory_space<vmem>>, vector<8x128xf32>,
    } else {
    }
    return
  }
  func.func @transform_0(%arg0: i32, %arg1: i32) -> (i32, i32) {
    %c0_i32 = arith.constant 0 : i32
    %c0_i32_0 = arith.constant 0 : i32
    return %c0_i32, %arg1 : i32, i32
  }
  func.func @transform_1(%arg0: i32, %arg1: i32) -> (i32, i32) {
    %c0_i32 = arith.constant 0 : i32
    return %arg0, %arg1 : i32, i32
  }
  func.func @transform_2(%arg0: i32, %arg1: i32) -> (i32, i32) {
    %c0_i32 = arith.constant 0 : i32
    %c0_i32_0 = arith.constant 0 : i32
    return %arg1, %c0_i32 : i32, i32
  }
  func.func @transform_3(%arg0: i32, %arg1: i32) -> (i32, i32) {
    %c0_i32 = arith.constant 0 : i32
    %c0_i32_0 = arith.constant 0 : i32
    return %arg0, %c0_i32 : i32, i32
  }
}

</mosaic_0001>

<bundles_post_ra>
// kernel: tpu_custom_call.1
= control target key start
LH: loop header
LB: loop body
LE: loop exit
PB: predicated region body
PF: predicated region fallthrough
CT: control target
= control target key end

     0   :  { %8 = vsyncpa [#allocation5], 0  ;;  %s392_s0 = inlined_call_operand.hbm [shape: f32[1,128], index: 0, kind: input, shape index: {}]   ;;  %s393_s1 = inlined_call_operand.hbm [shape: bf16[8,128], index: 1, kind: input, shape index: {}]   ;;  %s394_s2 = inlined_call_operand.hbm [shape: f32[128,128], index: 2, kind: input, shape index: {}]   ;;  %s395_s3 = inlined_call_operand.hbm [shape: f32[8,128], index: 3, kind: output, shape index: {}]  }
   0x1   :  { %9 = vsyncpa [#allocation8], 0 }
   0x2   :  { %10 = vsyncpa [#allocation6], 0  ;;  %s349_s12 = smov [#allocation7]   ;;  %s350_s14 = smov [#allocation4]  }
   0x3   :  { %s27_s13 = sshll.u32 %s349_s12, 4  ;;  %s17_s15 = sshll.u32 %s350_s14, 4  ;;  %s28_s13 = int_to_ptr.vmem [resolvable:$true] %s27_s13  ;;  %s18_s15 = int_to_ptr.vmem [resolvable:$true] %s17_s15 }
   0x4   :  { %s271_s16 = scalar_lea.vmem %s28_s13, 64  ;;  %p276_p1 = scmp.lt.s32.totalorder %s28_s13, %s28_s13 }
   0x5   :  { %p272_p0 = scmp.ne.s32.totalorder %s28_s13, %s271_s16  ;;  %p277_p2 = scmp.lt.s32.totalorder %s271_s16, %s271_s16 }
   0x7   :  { %p278_p3 = por %p277_p2, %p276_p1 }
   0x9   :  { %p279_p4 = pnand %p278_p3, %p272_p0 }
   0xb   :  { %282 = shalt.err (!%p279_p4)
}
   0xc   :  { %30 = dma.hbm_to_vmem [thread:$0]  %s393_s1, 64, %s28_s13, [#allocation8]  }
   0xd   :  { %s291_s19 = scalar_lea.vmem %s18_s15, 16  ;;  %s295_s20 = scalar_lea.vmem %s18_s15, 32 }
   0xe   :  { %p292_p5 = scmp.ne.s32.totalorder %s18_s15, %s291_s19  ;;  %p296_p6 = scmp.lt.s32.totalorder %s18_s15, %s18_s15 }
   0xf   :  { %p297_p7 = scmp.lt.s32.totalorder %s295_s20, %s291_s19 }
  0x11   :  { %p298_p8 = por %p297_p7, %p296_p6 }
  0x13   :  { %p299_p9 = pnand %p298_p8, %p292_p5 }
  0x15   :  { %302 = shalt.err (!%p299_p9)
}
  0x16   :  { %20 = dma.hbm_to_vmem [thread:$0]  %s392_s0, 16, %s18_s15, [#allocation5]  }
  0x17   :  { %s351_s23 = smov [#allocation9]  }
  0x18   :  { %s36_s24 = sshll.u32 %s351_s23, 4  ;;  %s37_s24 = int_to_ptr.vmem [resolvable:$true] %s36_s24 }
  0x19   :  { %s311_s25 = scalar_lea.vmem %s37_s24, 2048  ;;  %p316_p11 = scmp.lt.s32.totalorder %s37_s24, %s37_s24 }
  0x1a   :  { %p312_p10 = scmp.ne.s32.totalorder %s37_s24, %s311_s25  ;;  %p317_p12 = scmp.lt.s32.totalorder %s311_s25, %s311_s25 }
  0x1c   :  { %p318_p13 = por %p317_p12, %p316_p11 }
  0x1e   :  { %p319_p0 = pnand %p318_p13, %p312_p10 }
  0x20   :  { %322 = shalt.err (!%p319_p0)
}
  0x21   :  { %s352_s1 = smov 128   ;;  %s353_s26 = smov 8  }
  0x22   :  { %42 = dma.hbm_to_vmem [thread:$0]  %s394_s2, 2048, %s37_s24, [#allocation8], %s352_s1, %s352_s1, %s353_s26  }
  0x23   :  { %343 = dma.done.wait [#allocation5], 16  }
  0x24   :  { %344 = vsyncadd [#allocation5], 4294967280 }
  0x25   :  { %345 = dma.done.wait [#allocation8], 2112  }
  0x26   :  { %346 = vsyncadd [#allocation8], 4294965184  ;;  %vm57_vm0 = vcmask 7168   ;;  %v354_v0 = vmov 0.0   ;;  %vm355_vm1 = vmmov 0   ;;  %v91_v3 = vld [vmem:[#allocation9 + $0x78] sm:$0xff] }
  0x27   :  { %216 = vmatprep.subr.mxu0 %v354_v0  ;;  %248 = vmatprep.mubr.msk.f32.mxu0 %vm355_vm1, %v354_v0  ;;  %58 = vst.msk [vmem:[#allocation3] sm:$0xff] %vm57_vm0, %v354_v0  ;;  %v198_v1 = vld [vmem:[#allocation4] ss:$0 sm:$0xff]  ;;  %v60_v2 = vld [vmem:[#allocation7] sm:$0xf]  ;;  %v90_v5 = vld [vmem:[#allocation9 + $0x70] sm:$0xff] }
  0x28   :  { %v61_v4 = vunpack.c.l.bf16 %v60_v2  ;;  %217 = vmatpush3.msra.mxu0 %v91_v3  ;;  %v89_v6 = vld [vmem:[#allocation9 + $0x68] sm:$0xff]  ;;  %v88_v8 = vld [vmem:[#allocation9 + $0x60] sm:$0xff]  ;;  %v87_v9 = vld [vmem:[#allocation9 + $0x58] sm:$0xff]  ;;  %v356_v16 = vmov 0   ;;  %s357_s0 = smov [#allocation10]  }
  0x29   :  { %218 = vmatprep.subr.mxu0 %v354_v0  ;;  %v86_v10 = vld [vmem:[#allocation9 + $0x50] sm:$0xff]  ;;  %v85_v11 = vld [vmem:[#allocation9 + $0x48] sm:$0xff]  ;;  %v84_v12 = vld [vmem:[#allocation9 + $0x40] sm:$0xff]  ;;  %260 = vset.pattern.permute.xlu0 %v356_v16  ;;  %s188_s2 = sshll.u32 %s357_s0, 4  ;;  %s189_s2 = int_to_ptr.vmem [resolvable:$true] %s188_s2 }
  0x2a   :  { %v68_v7 = vmul.f32 %v198_v1, %v61_v4  ;;  %219 = vmatpush3.msra.mxu0 %v90_v5  ;;  %v83_v13 = vld [vmem:[#allocation9 + $0x38] sm:$0xff]  ;;  %v82_v14 = vld [vmem:[#allocation9 + $0x30] sm:$0xff]  ;;  %v81_v15 = vld [vmem:[#allocation9 + $0x28] sm:$0xff]  ;;  %s323_s29 = scalar_lea.vmem %s189_s2, 128  ;;  %p328_p2 = scmp.lt.s32.totalorder %s189_s2, %s189_s2 }
  0x2b   :  { %220 = vmatprep.subr.mxu0 %v354_v0  ;;  %v80_v17 = vld [vmem:[#allocation9 + $0x20] sm:$0xff]  ;;  %v79_v18 = vld [vmem:[#allocation9 + $0x18] sm:$0xff]  ;;  %v78_v19 = vld [vmem:[#allocation9 + $0x10] sm:$0xff]  ;;  %p324_p1 = scmp.ne.s32.totalorder %s189_s2, %s323_s29  ;;  %p329_p3 = scmp.lt.s32.totalorder %s323_s29, %s323_s29 }
  0x2c   :  { %70 = vadd.xlane.f32.xlu0 %v68_v7  ;;  %221 = vmatpush3.msra.mxu0 %v89_v6  ;;  %v77_v20 = vld [vmem:[#allocation9 + $0x8] sm:$0xff]  ;;  %v76_v21 = vld [vmem:[#allocation9] sm:$0xff] }
  0x2d   :  { %222 = vmatprep.subr.mxu0 %v354_v0  ;;  %p330_p4 = por %p329_p3, %p328_p2 }
  0x2e   :  { %223 = vmatpush3.msra.mxu0 %v88_v8  ;;  %v69_v22 = vld [vmem:[#allocation3] sm:$0xff] }
  0x2f   :  { %224 = vmatprep.subr.mxu0 %v354_v0  ;;  %p331_p5 = pnand %p330_p4, %p324_p1 }
  0x30   :  { %225 = vmatpush3.msra.mxu0 %v87_v9 }
  0x31   :  { %226 = vmatprep.subr.mxu0 %v354_v0 }
  0x32   :  { %227 = vmatpush3.msra.mxu0 %v86_v10 }
  0x33   :  { %228 = vmatprep.subr.mxu0 %v354_v0 }
  0x34   :  { %229 = vmatpush3.msra.mxu0 %v85_v11 }
  0x35   :  { %230 = vmatprep.subr.mxu0 %v354_v0 }
  0x36   :  { %231 = vmatpush3.msra.mxu0 %v84_v12 }
  0x37   :  { %232 = vmatprep.subr.mxu0 %v354_v0 }
  0x38   :  { %233 = vmatpush3.msra.mxu0 %v83_v13 }
  0x39   :  { %234 = vmatprep.subr.mxu0 %v354_v0 }
  0x3a   :  { %235 = vmatpush3.msra.mxu0 %v82_v14 }
  0x3b   :  { %236 = vmatprep.subr.mxu0 %v354_v0 }
  0x3c   :  { %237 = vmatpush3.msra.mxu0 %v81_v15 }
  0x3d   :  { %238 = vmatprep.subr.mxu0 %v354_v0 }
  0x3e   :  { %239 = vmatpush3.msra.mxu0 %v80_v17 }
  0x3f   :  { %240 = vmatprep.subr.mxu0 %v354_v0 }
  0x40   :  { %241 = vmatpush3.msra.mxu0 %v79_v18 }
  0x41   :  { %242 = vmatprep.subr.mxu0 %v354_v0 }
  0x42   :  { %243 = vmatpush3.msra.mxu0 %v78_v19 }
  0x43   :  { %244 = vmatprep.subr.mxu0 %v354_v0 }
  0x44   :  { %245 = vmatpush3.msra.mxu0 %v77_v20 }
  0x45   :  { %246 = vmatprep.subr.mxu0 %v354_v0 }
  0x46   :  { %247 = vmatpush3.msra.mxu0 %v76_v21 }
  0x47   :  { %249 = vmatmul.mubr.f32.vlgmr.msra.gmra.mxu0 %v68_v7 }
  0xb5   :  { %v71_v23 = vpop.xlane.xlu0 %70 }
  0xb6   :  { %v72_v24 = vadd.f32 %v71_v23, %v69_v22 }
  0xb8   :  { %74 = vst.msk [vmem:[#allocation3] sm:$0xff] %vm57_vm0, %v72_v24 }
  0xbf   :  { %v167_v25 = vld [vmem:[#allocation3] sm:$0xff] }
  0xc0   :  { %vm168_vm2 = vcmp.gt.f32.partialorder %v167_v25, 0.0 }
  0xc1   :  { %v169_v26 = vsel %vm168_vm2, %v167_v25, 1.0 }
  0xc2   :  { %261 = vrcp.f32 %v169_v26 }
  0xcf   :  { %v262_v27 = vpop.eup %261 }
  0xd0   :  { %v171_v28 = vmul.f32 %v262_v27, %v169_v26 }
  0xd2   :  { %v172_v29 = vsub.f32 2.0, %v171_v28 }
  0xd4   :  { %v173_v30 = vmul.f32 %v262_v27, %v172_v29 }
  0xd6   :  { %177 = vperm.xlu0 %260, %v173_v30  }
 0x107   :  { %v158_v31 = vpop.f32.mrf.mxu0 }
 0x109   :  { %v250_v32 = vpop.f32.mrf.mxu0 }
 0x151   :  { %v178_v33 = vpop.permute.xlu0 %177 }
 0x152   :  { %v180_v34 = vmul.f32 %v178_v33, %v158_v31 }
 0x154   :  { %181 = vst [vmem:[#allocation10] sm:$0xff] %v180_v34 }
 0x155   :  { %334 = shalt.err (!%p331_p5)
}
 0x156   :  { %191 = dma.vmem_to_hbm [thread:$0]  %s189_s2, 128, %s395_s3, [#allocation6]  }
 0x157   :  { %347 = dma.done.wait [#allocation6], 128  }
 0x158   :  { %348 = vsyncadd [#allocation6], 4294967168 }
 0x159   :  { %195 = vsyncpa [#allocation5], 1 }
 0x15a   :  { %196 = vsyncpa [#allocation8], 1 }
 0x15b   :  { %197 = vsyncpa [#allocation6], 1 }

</bundles_post_ra>
